<compile_context>
chip_gen: v6e
topology: v6e:2x2x1
jax: 0.10.0
libtpu: 0.0.40
codegen_flags: <defaults>
</compile_context>

<pallas_src>
from functools import partial

import jax
import jax.numpy as jnp
from jax.experimental import pallas as pl
from jax.experimental.pallas import tpu as pltpu


def _round_up(x, m):
    return (x + m - 1) // m * m


def _gate_init_kernel(f_ref, s_ref, acc_ref):
    """Hop-0 term: acc = sigmoid(f . s) * f  (VPU/XLU/EUP only, no MXU)."""
    f = f_ref[...]                                             # (T, Dp) f32
    score = jax.nn.sigmoid(
        jnp.sum(f * s_ref[...], axis=-1, keepdims=True))       # (T, 1)
    acc_ref[...] = score * f


def _hop_kernel(adj_ref, fin_ref, accin_ref, s_ref, fout_ref, accout_ref,
                mm_ref, *, block_k):
    """One propagation hop at grid point (row tile i, contraction tile j).

    mm_ref (VMEM scratch, f32) accumulates A_hat[i, :] @ f over j; at the last
    j the new features are stored (bf16) and their sigmoid-gated contribution
    is added to the running accumulator (aliased in/out, f32).

    block_k = None  -> fin_ref is already the (T, Dp) contraction block.
    block_k = T     -> fin_ref is the full VMEM-resident (N_pad, Dp) feature
                       matrix; slice the j-th (T, Dp) panel out of it.
    """
    j = pl.program_id(1)

    @pl.when(j == 0)
    def _():
        mm_ref[...] = jnp.zeros_like(mm_ref)

    if block_k is None:
        f_blk = fin_ref[...]                                   # (T, Dp) bf16
    else:
        start = pl.multiple_of(j * block_k, block_k)
        f_blk = fin_ref[pl.ds(start, block_k), :]              # (T, Dp) bf16

    # bf16 x bf16 MXU matmul, f32 accumulation.
    mm_ref[...] += jnp.dot(adj_ref[...], f_blk,
                           preferred_element_type=jnp.float32)

    @pl.when(j == pl.num_programs(1) - 1)
    def _():
        f_new = mm_ref[...]                                    # (T, Dp) f32
        # Gating on VPU (mul) + XLU (lane reduce) + EUP (sigmoid): keeps the
        # width-1 dot off the MXU.
        score = jax.nn.sigmoid(
            jnp.sum(f_new * s_ref[...], axis=-1, keepdims=True))
        fout_ref[...] = f_new.astype(fout_ref.dtype)           # bf16 to HBM
        accout_ref[...] = accin_ref[...] + score * f_new


@partial(jax.jit, static_argnums=(3,), static_argnames=("tile",))
def dagnn_conv(adj, feats, s, k, *, tile=1024):
    """adj: (N, N) dense adjacency (adj[dst, src] = 1), feats: (N, D), s: (D, 1)."""
    N, D = feats.shape
    D_pad = _round_up(D, 128)
    T = min(tile, _round_up(N, 128))       # row/contraction tile, mult. of 128
    N_pad = _round_up(N, T)
    n_tiles = N_pad // T

    # ---- one-time preprocessing (plain JAX, HBM resident; cacheable) --------
    degs = jnp.sum(adj.astype(jnp.float32), axis=1)            # in-degrees
    # Clamp so isolated nodes contribute 0 in hops >= 1 instead of NaN
    # (PyTorch would produce NaN for zero in-degree nodes).
    degs = jnp.where(degs > 0, degs, 1.0)
    norm = jax.lax.rsqrt(degs)
    # Fold symmetric normalization into the adjacency once; pad; cast to bf16.
    a_hat = norm[:, None] * adj.astype(jnp.float32) * norm[None, :]
    a_hat = jnp.pad(a_hat, ((0, N_pad - N), (0, N_pad - N))).astype(jnp.bfloat16)

    f0 = jnp.pad(feats.astype(jnp.float32),
                 ((0, N_pad - N), (0, D_pad - D)))             # lane-dense, f32
    f0_bf16 = f0.astype(jnp.bfloat16)                          # matmul feed
    s_row = jnp.pad(s.astype(jnp.float32).reshape(1, D),
                    ((0, 0), (0, D_pad - D)))                  # (1, Dp)

    # ---- hop-0 gated term (uses the original f32 features) ------------------
    acc = pl.pallas_call(
        _gate_init_kernel,
        out_shape=jax.ShapeDtypeStruct((N_pad, D_pad), jnp.float32),
        grid=(n_tiles,),
        in_specs=[pl.BlockSpec((T, D_pad), lambda i: (i, 0)),
                  pl.BlockSpec((1, D_pad), lambda i: (0, 0))],
        out_specs=pl.BlockSpec((T, D_pad), lambda i: (i, 0)),
        compiler_params=pltpu.CompilerParams(
            dimension_semantics=("parallel",)),
    )(f0, s_row)

    # ---- feature operand: VMEM-resident if small, otherwise streamed --------
    if (N_pad * D_pad * 2 <= 4 * 1024 * 1024) and n_tiles > 1:
        # Whole bf16 feature matrix stays in VMEM for the hop (constant block
        # index -> fetched once); kernel slices the contraction panel itself.
        fin_spec = pl.BlockSpec((N_pad, D_pad), lambda i, j: (0, 0))
        block_k = T
    else:
        fin_spec = pl.BlockSpec((T, D_pad), lambda i, j: (j, 0))
        block_k = None

    # ---- one tiled pallas_call per propagation hop ---------------------------
    hop = pl.pallas_call(
        partial(_hop_kernel, block_k=block_k),
        out_shape=(jax.ShapeDtypeStruct((N_pad, D_pad), jnp.bfloat16),   # f_next
                   jax.ShapeDtypeStruct((N_pad, D_pad), jnp.float32)),   # acc
        grid=(n_tiles, n_tiles),                 # (row tiles, contraction tiles)
        in_specs=[
            pl.BlockSpec((T, T), lambda i, j: (i, j)),        # A_hat tile (bf16)
            fin_spec,                                         # feats (bf16)
            pl.BlockSpec((T, D_pad), lambda i, j: (i, 0)),    # running acc (in)
            pl.BlockSpec((1, D_pad), lambda i, j: (0, 0)),    # gating vector s
        ],
        out_specs=(pl.BlockSpec((T, D_pad), lambda i, j: (i, 0)),
                   pl.BlockSpec((T, D_pad), lambda i, j: (i, 0))),
        scratch_shapes=[pltpu.VMEM((T, D_pad), jnp.float32)],  # matmul accumulator
        input_output_aliases={2: 1},                           # acc updated in place
        compiler_params=pltpu.CompilerParams(
            dimension_semantics=("parallel", "arbitrary"),
            vmem_limit_bytes=32 * 1024 * 1024),
        cost_estimate=pl.CostEstimate(
            flops=2 * N_pad * N_pad * D_pad,
            transcendentals=N_pad,
            bytes_accessed=2 * N_pad * N_pad + 6 * N_pad * D_pad),
    )

    f = f0_bf16
    for _ in range(k):                      # k is small & static -> unrolled
        f, acc = hop(a_hat, f, acc, s_row)

    return acc[:N, :D]


def dagnn_conv_ref(adj, feats, s, k):
    """Pure-JAX reference mirroring the PyTorch forward literally (f32)."""
    degs = jnp.sum(adj, axis=1)
    norm = jnp.power(degs, -0.5)[:, None]
    results = [feats]
    f = feats
    for _ in range(k):
        f = (adj @ (f * norm)) * norm
        results.append(f)
    H = jnp.stack(results, axis=1)                          # (N, k+1, D)
    S = jax.nn.sigmoid(jnp.einsum("nkd,do->nko", H, s))     # (N, k+1, 1)
    S = jnp.transpose(S, (0, 2, 1))                         # (N, 1, k+1)
    return jnp.einsum("nok,nkd->nod", S, H).squeeze(1)


if __name__ == "__main__":
    key = jax.random.PRNGKey(0)
    k_adj, k_feat, k_s = jax.random.split(key, 3)

    N = 64      # number of graph nodes
    D = 32      # in_dim (hidden feature size)
    K = 4       # number of propagation hops

    # Deterministic random graph with self-loops (every node has in-degree > 0).
    adj = (jax.random.uniform(k_adj, (N, N)) < 0.15).astype(jnp.float32)
    adj = jnp.maximum(adj, jnp.eye(N, dtype=jnp.float32))

    feats = jax.random.normal(k_feat, (N, D), dtype=jnp.float32)

    # Parameter s: (in_dim, 1), xavier_uniform with gain('sigmoid') == 1.0
    gain = 1.0
    bound = gain * (6.0 / (D + 1)) ** 0.5
    s = jax.random.uniform(k_s, (D, 1), dtype=jnp.float32,
                           minval=-bound, maxval=bound)

    out = jax.block_until_ready(dagnn_conv(adj, feats, s, K))
    ref = dagnn_conv_ref(adj, feats, s, K)

    assert out.shape == (N, D)
    # bf16 normalized adjacency / bf16 MXU inputs (f32 accumulate) vs f32 ref:
    # expected error ~1e-2 worst case over k=4 hops.
    assert jnp.allclose(out, ref, atol=5e-2, rtol=5e-2), "mismatch vs reference"

    print("KERNEL_OK")
</pallas_src>

<mosaic_0001>
module attributes {stable_mosaic.version = 11 : i64} {
  func.func @_hop_kernel(%arg0: i32, %arg1: i32, %arg2: memref<128x128xbf16, #tpu.memory_space<vmem>>, %arg3: memref<128x128xbf16, #tpu.memory_space<vmem>>, %arg4: memref<128x128xf32, #tpu.memory_space<vmem>>, %arg5: memref<1x128xf32, #tpu.memory_space<vmem>>, %arg6: memref<128x128xbf16, #tpu.memory_space<vmem>>, %arg7: memref<128x128xf32, #tpu.memory_space<vmem>>, %arg8: memref<128x128xf32, #tpu.memory_space<vmem>>) attributes {dimension_semantics = [#tpu.dimension_semantics<parallel>, #tpu.dimension_semantics<arbitrary>], iteration_bounds = array<i64: 1, 1>, scalar_prefetch = 0 : i64, scratch_operands = 1 : i64, tpu.core_type = #tpu.core_type<tc>, window_params = [{transform_indices = @transform_0, window_bounds = array<i64: 128, 128>}, {transform_indices = @transform_1, window_bounds = array<i64: 128, 128>}, {transform_indices = @transform_2, window_bounds = array<i64: 128, 128>}, {pipeline_mode = #tpu.pipeline_mode<synchronous>, transform_indices = @transform_3, window_bounds = array<i64: 1, 128>}, {transform_indices = @transform_4, window_bounds = array<i64: 128, 128>}, {transform_indices = @transform_5, window_bounds = array<i64: 128, 128>}]} {
    %c0_i32 = arith.constant 0 : i32
    %0 = arith.cmpi eq, %arg1, %c0_i32 : i32
    %1 = arith.extui %0 : i1 to i32
    %c0_i32_0 = arith.constant 0 : i32
    %2 = arith.cmpi ne, %1, %c0_i32_0 : i32
    scf.if %2 {
      %cst_10 = arith.constant 0.000000e+00 : f32
      %12 = vector.broadcast %cst_10 : f32 to vector<128x128xf32>
      %c0_11 = arith.constant 0 : index
      %c0_12 = arith.constant 0 : index
      %13 = vector.load %arg8[%c0_11, %c0_12] : memref<128x128xf32, #tpu.memory_space<vmem>>, vector<128x128xf32>
      tpu.vector_store %arg8[%c0_11, %c0_12], %12 {strides = array<i32>} : memref<128x128xf32, #tpu.memory_space<vmem>>, vector<128x128xf32>,
    } else {
    }
    %c0 = arith.constant 0 : index
    %c0_1 = arith.constant 0 : index
    %3 = vector.load %arg3[%c0, %c0_1] : memref<128x128xbf16, #tpu.memory_space<vmem>>, vector<128x128xbf16>
    %c0_2 = arith.constant 0 : index
    %c0_3 = arith.constant 0 : index
    %4 = vector.load %arg8[%c0_2, %c0_3] : memref<128x128xf32, #tpu.memory_space<vmem>>, vector<128x128xf32>
    %c0_4 = arith.constant 0 : index
    %c0_5 = arith.constant 0 : index
    %5 = vector.load %arg2[%c0_4, %c0_5] : memref<128x128xbf16, #tpu.memory_space<vmem>>, vector<128x128xbf16>
    %cst = arith.constant dense<0.000000e+00> : vector<128x128xf32>
    %6 = tpu.matmul %5, %3, %cst {dimension_numbers = #tpu.dot_dimension_numbers<[1], [0], [0], [1], [0, 0, 1, 1], [], []>} : vector<128x128xbf16>, vector<128x128xbf16>, vector<128x128xf32> -> vector<128x128xf32>
    %7 = arith.addf %4, %6 : vector<128x128xf32>
    %c0_6 = arith.constant 0 : index
    %c0_7 = arith.constant 0 : index
    %8 = vector.load %arg8[%c0_6, %c0_7] : memref<128x128xf32, #tpu.memory_space<vmem>>, vector<128x128xf32>
    tpu.vector_store %arg8[%c0_6, %c0_7], %7 {strides = array<i32>} : memref<128x128xf32, #tpu.memory_space<vmem>>, vector<128x128xf32>,
    %c0_i32_8 = arith.constant 0 : i32
    %9 = arith.cmpi eq, %arg1, %c0_i32_8 : i32
    %10 = arith.extui %9 : i1 to i32
    %c0_i32_9 = arith.constant 0 : i32
    %11 = arith.cmpi ne, %10, %c0_i32_9 : i32
    scf.if %11 {
      %c0_10 = arith.constant 0 : index
      %c0_11 = arith.constant 0 : index
      %12 = vector.load %arg8[%c0_10, %c0_11] : memref<128x128xf32, #tpu.memory_space<vmem>>, vector<128x128xf32>
      %c0_12 = arith.constant 0 : index
      %c0_13 = arith.constant 0 : index
      %13 = vector.load %arg5[%c0_12, %c0_13] : memref<1x128xf32, #tpu.memory_space<vmem>>, vector<1x128xf32>
      %14 = vector.broadcast %13 : vector<1x128xf32> to vector<128x128xf32>
      %15 = arith.mulf %12, %14 : vector<128x128xf32>
      %cst_14 = arith.constant dense<0.000000e+00> : vector<128xf32>
      %16 = vector.multi_reduction <add>, %15, %cst_14 [1] : vector<128x128xf32> to vector<128xf32>
      %17 = vector.shape_cast %16 : vector<128xf32> to vector<128x1xf32>
      %18 = arith.negf %17 : vector<128x1xf32>
      %19 = math.exp %18 : vector<128x1xf32>
      %cst_15 = arith.constant 1.000000e+00 : f32
      %20 = vector.broadcast %cst_15 : f32 to vector<128x1xf32>
      %21 = arith.addf %20, %19 : vector<128x1xf32>
      %22 = arith.divf %20, %21 : vector<128x1xf32>
      %23 = arith.truncf %12 : vector<128x128xf32> to vector<128x128xbf16>
      %c0_16 = arith.constant 0 : index
      %c0_17 = arith.constant 0 : index
      %24 = vector.load %arg6[%c0_16, %c0_17] : memref<128x128xbf16, #tpu.memory_space<vmem>>, vector<128x128xbf16>
      tpu.vector_store %arg6[%c0_16, %c0_17], %23 {strides = array<i32>} : memref<128x128xbf16, #tpu.memory_space<vmem>>, vector<128x128xbf16>,
      %c0_18 = arith.constant 0 : index
      %c0_19 = arith.constant 0 : index
      %25 = vector.load %arg4[%c0_18, %c0_19] : memref<128x128xf32, #tpu.memory_space<vmem>>, vector<128x128xf32>
      %26 = vector.broadcast %22 : vector<128x1xf32> to vector<128x128xf32>
      %27 = arith.mulf %26, %12 : vector<128x128xf32>
      %28 = arith.addf %25, %27 : vector<128x128xf32>
      %c0_20 = arith.constant 0 : index
      %c0_21 = arith.constant 0 : index
      %29 = vector.load %arg7[%c0_20, %c0_21] : memref<128x128xf32, #tpu.memory_space<vmem>>, vector<128x128xf32>
      tpu.vector_store %arg7[%c0_20, %c0_21], %28 {strides = array<i32>} : memref<128x128xf32, #tpu.memory_space<vmem>>, vector<128x128xf32>,
    } else {
    }
    return
  }
  func.func @transform_0(%arg0: i32, %arg1: i32) -> (i32, i32) {
    %c0_i32 = arith.constant 0 : i32
    return %arg0, %arg1 : i32, i32
  }
  func.func @transform_1(%arg0: i32, %arg1: i32) -> (i32, i32) {
    %c0_i32 = arith.constant 0 : i32
    %c0_i32_0 = arith.constant 0 : i32
    return %arg1, %c0_i32 : i32, i32
  }
  func.func @transform_2(%arg0: i32, %arg1: i32) -> (i32, i32) {
    %c0_i32 = arith.constant 0 : i32
    %c0_i32_0 = arith.constant 0 : i32
    return %arg0, %c0_i32 : i32, i32
  }
  func.func @transform_3(%arg0: i32, %arg1: i32) -> (i32, i32) {
    %c0_i32 = arith.constant 0 : i32
    %c0_i32_0 = arith.constant 0 : i32
    %c0_i32_1 = arith.constant 0 : i32
    return %c0_i32, %c0_i32_0 : i32, i32
  }
  func.func @transform_4(%arg0: i32, %arg1: i32) -> (i32, i32) {
    %c0_i32 = arith.constant 0 : i32
    %c0_i32_0 = arith.constant 0 : i32
    return %arg0, %c0_i32 : i32, i32
  }
  func.func @transform_5(%arg0: i32, %arg1: i32) -> (i32, i32) {
    %c0_i32 = arith.constant 0 : i32
    %c0_i32_0 = arith.constant 0 : i32
    return %arg0, %c0_i32 : i32, i32
  }
}

module attributes {stable_mosaic.version = 11 : i64} {
  func.func @_hop_kernel(%arg0: i32, %arg1: i32, %arg2: memref<128x128xbf16, #tpu.memory_space<vmem>>, %arg3: memref<128x128xbf16, #tpu.memory_space<vmem>>, %arg4: memref<128x128xf32, #tpu.memory_space<vmem>>, %arg5: memref<1x128xf32, #tpu.memory_space<vmem>>, %arg6: memref<128x128xbf16, #tpu.memory_space<vmem>>, %arg7: memref<128x128xf32, #tpu.memory_space<vmem>>, %arg8: memref<128x128xf32, #tpu.memory_space<vmem>>) attributes {dimension_semantics = [#tpu.dimension_semantics<parallel>, #tpu.dimension_semantics<arbitrary>], iteration_bounds = array<i64: 1, 1>, scalar_prefetch = 0 : i64, scratch_operands = 1 : i64, tpu.core_type = #tpu.core_type<tc>, window_params = [{transform_indices = @transform_0, window_bounds = array<i64: 128, 128>}, {transform_indices = @transform_1, window_bounds = array<i64: 128, 128>}, {transform_indices = @transform_2, window_bounds = array<i64: 128, 128>}, {pipeline_mode = #tpu.pipeline_mode<synchronous>, transform_indices = @transform_3, window_bounds = array<i64: 1, 128>}, {transform_indices = @transform_4, window_bounds = array<i64: 128, 128>}, {transform_indices = @transform_5, window_bounds = array<i64: 128, 128>}]} {
    %c0_i32 = arith.constant 0 : i32
    %0 = arith.cmpi eq, %arg1, %c0_i32 : i32
    %1 = arith.extui %0 : i1 to i32
    %c0_i32_0 = arith.constant 0 : i32
    %2 = arith.cmpi ne, %1, %c0_i32_0 : i32
    scf.if %2 {
      %cst_10 = arith.constant 0.000000e+00 : f32
      %12 = vector.broadcast %cst_10 : f32 to vector<128x128xf32>
      %c0_11 = arith.constant 0 : index
      %c0_12 = arith.constant 0 : index
      %13 = vector.load %arg8[%c0_11, %c0_12] : memref<128x128xf32, #tpu.memory_space<vmem>>, vector<128x128xf32>
      tpu.vector_store %arg8[%c0_11, %c0_12], %12 {strides = array<i32>} : memref<128x128xf32, #tpu.memory_space<vmem>>, vector<128x128xf32>,
    } else {
    }
    %c0 = arith.constant 0 : index
    %c0_1 = arith.constant 0 : index
    %3 = vector.load %arg3[%c0, %c0_1] : memref<128x128xbf16, #tpu.memory_space<vmem>>, vector<128x128xbf16>
    %c0_2 = arith.constant 0 : index
    %c0_3 = arith.constant 0 : index
    %4 = vector.load %arg8[%c0_2, %c0_3] : memref<128x128xf32, #tpu.memory_space<vmem>>, vector<128x128xf32>
    %c0_4 = arith.constant 0 : index
    %c0_5 = arith.constant 0 : index
    %5 = vector.load %arg2[%c0_4, %c0_5] : memref<128x128xbf16, #tpu.memory_space<vmem>>, vector<128x128xbf16>
    %cst = arith.constant dense<0.000000e+00> : vector<128x128xf32>
    %6 = tpu.matmul %5, %3, %cst {dimension_numbers = #tpu.dot_dimension_numbers<[1], [0], [0], [1], [0, 0, 1, 1], [], []>} : vector<128x128xbf16>, vector<128x128xbf16>, vector<128x128xf32> -> vector<128x128xf32>
    %7 = arith.addf %4, %6 : vector<128x128xf32>
    %c0_6 = arith.constant 0 : index
    %c0_7 = arith.constant 0 : index
    %8 = vector.load %arg8[%c0_6, %c0_7] : memref<128x128xf32, #tpu.memory_space<vmem>>, vector<128x128xf32>
    tpu.vector_store %arg8[%c0_6, %c0_7], %7 {strides = array<i32>} : memref<128x128xf32, #tpu.memory_space<vmem>>, vector<128x128xf32>,
    %c0_i32_8 = arith.constant 0 : i32
    %9 = arith.cmpi eq, %arg1, %c0_i32_8 : i32
    %10 = arith.extui %9 : i1 to i32
    %c0_i32_9 = arith.constant 0 : i32
    %11 = arith.cmpi ne, %10, %c0_i32_9 : i32
    scf.if %11 {
      %c0_10 = arith.constant 0 : index
      %c0_11 = arith.constant 0 : index
      %12 = vector.load %arg8[%c0_10, %c0_11] : memref<128x128xf32, #tpu.memory_space<vmem>>, vector<128x128xf32>
      %c0_12 = arith.constant 0 : index
      %c0_13 = arith.constant 0 : index
      %13 = vector.load %arg5[%c0_12, %c0_13] : memref<1x128xf32, #tpu.memory_space<vmem>>, vector<1x128xf32>
      %14 = vector.broadcast %13 : vector<1x128xf32> to vector<128x128xf32>
      %15 = arith.mulf %12, %14 : vector<128x128xf32>
      %cst_14 = arith.constant dense<0.000000e+00> : vector<128xf32>
      %16 = vector.multi_reduction <add>, %15, %cst_14 [1] : vector<128x128xf32> to vector<128xf32>
      %17 = vector.shape_cast %16 : vector<128xf32> to vector<128x1xf32>
      %18 = arith.negf %17 : vector<128x1xf32>
      %19 = math.exp %18 : vector<128x1xf32>
      %cst_15 = arith.constant 1.000000e+00 : f32
      %20 = vector.broadcast %cst_15 : f32 to vector<128x1xf32>
      %21 = arith.addf %20, %19 : vector<128x1xf32>
      %22 = arith.divf %20, %21 : vector<128x1xf32>
      %23 = arith.truncf %12 : vector<128x128xf32> to vector<128x128xbf16>
      %c0_16 = arith.constant 0 : index
      %c0_17 = arith.constant 0 : index
      %24 = vector.load %arg6[%c0_16, %c0_17] : memref<128x128xbf16, #tpu.memory_space<vmem>>, vector<128x128xbf16>
      tpu.vector_store %arg6[%c0_16, %c0_17], %23 {strides = array<i32>} : memref<128x128xbf16, #tpu.memory_space<vmem>>, vector<128x128xbf16>,
      %c0_18 = arith.constant 0 : index
      %c0_19 = arith.constant 0 : index
      %25 = vector.load %arg4[%c0_18, %c0_19] : memref<128x128xf32, #tpu.memory_space<vmem>>, vector<128x128xf32>
      %26 = vector.broadcast %22 : vector<128x1xf32> to vector<128x128xf32>
      %27 = arith.mulf %26, %12 : vector<128x128xf32>
      %28 = arith.addf %25, %27 : vector<128x128xf32>
      %c0_20 = arith.constant 0 : index
      %c0_21 = arith.constant 0 : index
      %29 = vector.load %arg7[%c0_20, %c0_21] : memref<128x128xf32, #tpu.memory_space<vmem>>, vector<128x128xf32>
      tpu.vector_store %arg7[%c0_20, %c0_21], %28 {strides = array<i32>} : memref<128x128xf32, #tpu.memory_space<vmem>>, vector<128x128xf32>,
    } else {
    }
    return
  }
  func.func @transform_0(%arg0: i32, %arg1: i32) -> (i32, i32) {
    %c0_i32 = arith.constant 0 : i32
    return %arg0, %arg1 : i32, i32
  }
  func.func @transform_1(%arg0: i32, %arg1: i32) -> (i32, i32) {
    %c0_i32 = arith.constant 0 : i32
    %c0_i32_0 = arith.constant 0 : i32
    return %arg1, %c0_i32 : i32, i32
  }
  func.func @transform_2(%arg0: i32, %arg1: i32) -> (i32, i32) {
    %c0_i32 = arith.constant 0 : i32
    %c0_i32_0 = arith.constant 0 : i32
    return %arg0, %c0_i32 : i32, i32
  }
  func.func @transform_3(%arg0: i32, %arg1: i32) -> (i32, i32) {
    %c0_i32 = arith.constant 0 : i32
    %c0_i32_0 = arith.constant 0 : i32
    %c0_i32_1 = arith.constant 0 : i32
    return %c0_i32, %c0_i32_0 : i32, i32
  }
  func.func @transform_4(%arg0: i32, %arg1: i32) -> (i32, i32) {
    %c0_i32 = arith.constant 0 : i32
    %c0_i32_0 = arith.constant 0 : i32
    return %arg0, %c0_i32 : i32, i32
  }
  func.func @transform_5(%arg0: i32, %arg1: i32) -> (i32, i32) {
    %c0_i32 = arith.constant 0 : i32
    %c0_i32_0 = arith.constant 0 : i32
    return %arg0, %c0_i32 : i32, i32
  }
}

module attributes {stable_mosaic.version = 11 : i64} {
  func.func @_gate_init_kernel(%arg0: i32, %arg1: memref<128x128xf32, #tpu.memory_space<vmem>>, %arg2: memref<1x128xf32, #tpu.memory_space<vmem>>, %arg3: memref<128x128xf32, #tpu.memory_space<vmem>>) attributes {dimension_semantics = [#tpu.dimension_semantics<parallel>], iteration_bounds = array<i64: 1>, scalar_prefetch = 0 : i64, scratch_operands = 0 : i64, tpu.core_type = #tpu.core_type<tc>, window_params = [{transform_indices = @transform_0, window_bounds = array<i64: 128, 128>}, {pipeline_mode = #tpu.pipeline_mode<synchronous>, transform_indices = @transform_1, window_bounds = array<i64: 1, 128>}, {transform_indices = @transform_2, window_bounds = array<i64: 128, 128>}]} {
    %c0 = arith.constant 0 : index
    %c0_0 = arith.constant 0 : index
    %0 = vector.load %arg1[%c0, %c0_0] : memref<128x128xf32, #tpu.memory_space<vmem>>, vector<128x128xf32>
    %c0_1 = arith.constant 0 : index
    %c0_2 = arith.constant 0 : index
    %1 = vector.load %arg2[%c0_1, %c0_2] : memref<1x128xf32, #tpu.memory_space<vmem>>, vector<1x128xf32>
    %2 = vector.broadcast %1 : vector<1x128xf32> to vector<128x128xf32>
    %3 = arith.mulf %0, %2 : vector<128x128xf32>
    %cst = arith.constant dense<0.000000e+00> : vector<128xf32>
    %4 = vector.multi_reduction <add>, %3, %cst [1] : vector<128x128xf32> to vector<128xf32>
    %5 = vector.shape_cast %4 : vector<128xf32> to vector<128x1xf32>
    %6 = arith.negf %5 : vector<128x1xf32>
    %7 = math.exp %6 : vector<128x1xf32>
    %cst_3 = arith.constant 1.000000e+00 : f32
    %8 = vector.broadcast %cst_3 : f32 to vector<128x1xf32>
    %9 = arith.addf %8, %7 : vector<128x1xf32>
    %10 = arith.divf %8, %9 : vector<128x1xf32>
    %11 = vector.broadcast %10 : vector<128x1xf32> to vector<128x128xf32>
    %12 = arith.mulf %11, %0 : vector<128x128xf32>
    %c0_4 = arith.constant 0 : index
    %c0_5 = arith.constant 0 : index
    %13 = vector.load %arg3[%c0_4, %c0_5] : memref<128x128xf32, #tpu.memory_space<vmem>>, vector<128x128xf32>
    tpu.vector_store %arg3[%c0_4, %c0_5], %12 {strides = array<i32>} : memref<128x128xf32, #tpu.memory_space<vmem>>, vector<128x128xf32>,
    return
  }
  func.func @transform_0(%arg0: i32) -> (i32, i32) {
    %c0_i32 = arith.constant 0 : i32
    %c0_i32_0 = arith.constant 0 : i32
    return %arg0, %c0_i32 : i32, i32
  }
  func.func @transform_1(%arg0: i32) -> (i32, i32) {
    %c0_i32 = arith.constant 0 : i32
    %c0_i32_0 = arith.constant 0 : i32
    %c0_i32_1 = arith.constant 0 : i32
    return %c0_i32, %c0_i32_0 : i32, i32
  }
  func.func @transform_2(%arg0: i32) -> (i32, i32) {
    %c0_i32 = arith.constant 0 : i32
    %c0_i32_0 = arith.constant 0 : i32
    return %arg0, %c0_i32 : i32, i32
  }
}

</mosaic_0001>

<bundles_post_ra>
// kernel: dagnn_conv.5
= control target key start
LH: loop header
LB: loop body
LE: loop exit
PB: predicated region body
PF: predicated region fallthrough
CT: control target
= control target key end

     0   :  { %s473_s0 = inlined_call_operand.vmem [shape: f32[128,128], index: 0, kind: input, shape index: {}]   ;;  %s474_s1 = inlined_call_operand.vmem [shape: f32[1,128], index: 1, kind: input, shape index: {}]   ;;  %s475_s2 = inlined_call_operand.vmem [shape: f32[128,128], index: 2, kind: output, shape index: {}]  }
   0x1   :  { %v313_v0 = vld [vmem:[%s473_s0 + $0x10] sm:$0xff]  ;;  %v214_v1 = vld [vmem:[%s474_s1] ss:$0 sm:$0xff]  ;;  %v328_v5 = vld [vmem:[%s473_s0 + $0x18] sm:$0xff] }
   0x2   :  { %v321_v2 = vld [vmem:[%s473_s0] sm:$0xff]  ;;  %v36_v3 = vmul.f32 %v214_v1, %v313_v0  ;;  %v333_v6 = vld [vmem:[%s473_s0 + $0x8] sm:$0xff]  ;;  %v37_v7 = vmul.f32 %v214_v1, %v328_v5  ;;  %v352_v13 = vld [vmem:[%s473_s0 + $0x38] sm:$0xff] }
   0x3   :  { %v34_v4 = vmul.f32 %v214_v1, %v321_v2  ;;  %v35_v8 = vmul.f32 %v214_v1, %v333_v6  ;;  %v340_v9 = vld [vmem:[%s473_s0 + $0x28] sm:$0xff]  ;;  %v345_v10 = vld [vmem:[%s473_s0 + $0x20] sm:$0xff]  ;;  %v357_v14 = vld [vmem:[%s473_s0 + $0x30] sm:$0xff]  ;;  %v41_v15 = vmul.f32 %v214_v1, %v352_v13 }
   0x4   :  { %54 = vadd.xlane.f32.xlu1 %v36_v3  ;;  %v39_v11 = vmul.f32 %v214_v1, %v340_v9  ;;  %v38_v12 = vmul.f32 %v214_v1, %v345_v10  ;;  %v40_v16 = vmul.f32 %v214_v1, %v357_v14  ;;  %v364_v17 = vld [vmem:[%s473_s0 + $0x48] sm:$0xff]  ;;  %v369_v18 = vld [vmem:[%s473_s0 + $0x40] sm:$0xff]  ;;  %v376_v21 = vld [vmem:[%s473_s0 + $0x58] sm:$0xff] }
   0x5   :  { %50 = vadd.xlane.f32.xlu0 %v34_v4  ;;  %v43_v19 = vmul.f32 %v214_v1, %v364_v17  ;;  %v42_v20 = vmul.f32 %v214_v1, %v369_v18  ;;  %v381_v22 = vld [vmem:[%s473_s0 + $0x50] sm:$0xff]  ;;  %v45_v23 = vmul.f32 %v214_v1, %v376_v21  ;;  %v388_v25 = vld [vmem:[%s473_s0 + $0x68] sm:$0xff]  ;;  %v393_v26 = vld [vmem:[%s473_s0 + $0x60] sm:$0xff] }
   0x6   :  { %v44_v24 = vmul.f32 %v214_v1, %v381_v22  ;;  %v47_v27 = vmul.f32 %v214_v1, %v388_v25  ;;  %v46_v28 = vmul.f32 %v214_v1, %v393_v26  ;;  %v400_v29 = vld [vmem:[%s473_s0 + $0x78] sm:$0xff]  ;;  %v405_v30 = vld [vmem:[%s473_s0 + $0x70] sm:$0xff] }
   0x7   :  { %v49_v31 = vmul.f32 %v214_v1, %v400_v29  ;;  %v48_v32 = vmul.f32 %v214_v1, %v405_v30 }
   0x8   :  { %56 = vadd.xlane.f32.xlu1 %v37_v7 }
   0x9   :  { %52 = vadd.xlane.f32.xlu0 %v35_v8 }
   0xc   :  { %60 = vadd.xlane.f32.xlu1 %v39_v11 }
   0xd   :  { %58 = vadd.xlane.f32.xlu0 %v38_v12 }
  0x10   :  { %64 = vadd.xlane.f32.xlu1 %v41_v15 }
  0x11   :  { %62 = vadd.xlane.f32.xlu0 %v40_v16 }
  0x14   :  { %68 = vadd.xlane.f32.xlu1 %v43_v19 }
  0x15   :  { %66 = vadd.xlane.f32.xlu0 %v42_v20 }
  0x18   :  { %72 = vadd.xlane.f32.xlu1 %v45_v23 }
  0x19   :  { %70 = vadd.xlane.f32.xlu0 %v44_v24 }
  0x1c   :  { %76 = vadd.xlane.f32.xlu1 %v47_v27 }
  0x1d   :  { %74 = vadd.xlane.f32.xlu0 %v46_v28 }
  0x20   :  { %80 = vadd.xlane.f32.xlu1 %v49_v31 }
  0x21   :  { %78 = vadd.xlane.f32.xlu0 %v48_v32 }
  0x8d   :  { %v55_v33 = vpop.xlane.xlu1 %54 }
  0x8e   :  { %v51_v34 = vpop.xlane.xlu0 %50  ;;  %v217_v35 = vmul.f32 -1.442695, %v55_v33 }
  0x8f   :  { %v215_v36 = vmul.f32 -1.442695, %v51_v34 }
  0x90   :  { %231 = vpow2.f32 %v217_v35 }
  0x91   :  { %233 = vpow2.f32 %v215_v36  ;;  %v57_v37 = vpop.xlane.xlu1 %56 }
  0x92   :  { %v53_v38 = vpop.xlane.xlu0 %52  ;;  %v218_v39 = vmul.f32 -1.442695, %v57_v37 }
  0x93   :  { %v216_v40 = vmul.f32 -1.442695, %v53_v38 }
  0x94   :  { %235 = vpow2.f32 %v218_v39 }
  0x95   :  { %237 = vpow2.f32 %v216_v40  ;;  %v61_v41 = vpop.xlane.xlu1 %60 }
  0x96   :  { %v59_v42 = vpop.xlane.xlu0 %58  ;;  %v220_v43 = vmul.f32 -1.442695, %v61_v41 }
  0x97   :  { %v219_v44 = vmul.f32 -1.442695, %v59_v42 }
  0x98   :  { %239 = vpow2.f32 %v220_v43 }
  0x99   :  { %241 = vpow2.f32 %v219_v44  ;;  %v65_v45 = vpop.xlane.xlu1 %64 }
  0x9a   :  { %v63_v46 = vpop.xlane.xlu0 %62  ;;  %v222_v47 = vmul.f32 -1.442695, %v65_v45 }
  0x9b   :  { %v221_v48 = vmul.f32 -1.442695, %v63_v46 }
  0x9c   :  { %243 = vpow2.f32 %v222_v47 }
  0x9d   :  { %v232_v49 = vpop.eup %231  ;;  %245 = vpow2.f32 %v221_v48  ;;  %v69_v50 = vpop.xlane.xlu1 %68 }
  0x9e   :  { %v67_v51 = vpop.xlane.xlu0 %66  ;;  %v234_v52 = vpop.eup %233  ;;  %v132_v53 = vadd.f32 1.0, %v232_v49  ;;  %v224_v54 = vmul.f32 -1.442695, %v69_v50 }
  0x9f   :  { %v130_v55 = vadd.f32 1.0, %v234_v52  ;;  %v223_v56 = vmul.f32 -1.442695, %v67_v51 }
  0xa0   :  { %247 = vrcp.f32 %v132_v53 }
  0xa1   :  { %v236_v57 = vpop.eup %235  ;;  %249 = vrcp.f32 %v130_v55  ;;  %v73_v58 = vpop.xlane.xlu1 %72 }
  0xa2   :  { %v71_v59 = vpop.xlane.xlu0 %70  ;;  %v238_v60 = vpop.eup %237  ;;  %v133_v61 = vadd.f32 1.0, %v236_v57  ;;  %251 = vpow2.f32 %v224_v54  ;;  %v226_v62 = vmul.f32 -1.442695, %v73_v58 }
  0xa3   :  { %v131_v63 = vadd.f32 1.0, %v238_v60  ;;  %253 = vpow2.f32 %v223_v56  ;;  %v225_v1 = vmul.f32 -1.442695, %v71_v59 }
  0xa4   :  { %255 = vrcp.f32 %v133_v61 }
  0xa5   :  { %v240_v3 = vpop.eup %239  ;;  %257 = vrcp.f32 %v131_v63  ;;  %v77_v4 = vpop.xlane.xlu1 %76 }
  0xa6   :  { %v75_v7 = vpop.xlane.xlu0 %74  ;;  %v242_v8 = vpop.eup %241  ;;  %v135_v11 = vadd.f32 1.0, %v240_v3  ;;  %259 = vpow2.f32 %v226_v62  ;;  %v228_v12 = vmul.f32 -1.442695, %v77_v4 }
  0xa7   :  { %v134_v15 = vadd.f32 1.0, %v242_v8  ;;  %261 = vpow2.f32 %v225_v1  ;;  %v227_v16 = vmul.f32 -1.442695, %v75_v7 }
  0xa8   :  { %263 = vrcp.f32 %v135_v11 }
  0xa9   :  { %v244_v19 = vpop.eup %243  ;;  %265 = vrcp.f32 %v134_v15  ;;  %v81_v20 = vpop.xlane.xlu1 %80 }
  0xaa   :  { %v79_v23 = vpop.xlane.xlu0 %78  ;;  %v246_v24 = vpop.eup %245  ;;  %v137_v27 = vadd.f32 1.0, %v244_v19  ;;  %267 = vpow2.f32 %v228_v12  ;;  %v230_v28 = vmul.f32 -1.442695, %v81_v20 }
  0xab   :  { %v136_v31 = vadd.f32 1.0, %v246_v24  ;;  %269 = vpow2.f32 %v227_v16  ;;  %v229_v32 = vmul.f32 -1.442695, %v79_v23 }
  0xac   :  { %271 = vrcp.f32 %v137_v27 }
  0xad   :  { %v248_v33 = vpop.eup %247  ;;  %273 = vrcp.f32 %v136_v31 }
  0xae   :  { %v250_v34 = vpop.eup %249  ;;  %v180_v35 = vmul.f32 %v248_v33, %v313_v0  ;;  %275 = vpow2.f32 %v230_v28 }
  0xaf   :  { %v252_v36 = vpop.eup %251  ;;  %v178_v37 = vmul.f32 %v250_v34, %v321_v2  ;;  %277 = vpow2.f32 %v229_v32 }
  0xb0   :  { %v254_v38 = vpop.eup %253  ;;  %196 = vst [vmem:[%s475_s2 + $0x10] sm:$0xff] %v180_v35  ;;  %v139_v39 = vadd.f32 1.0, %v252_v36 }
  0xb1   :  { %v256_v40 = vpop.eup %255  ;;  %194 = vst [vmem:[%s475_s2] sm:$0xff] %v178_v37  ;;  %v138_v41 = vadd.f32 1.0, %v254_v38 }
  0xb2   :  { %v258_v42 = vpop.eup %257  ;;  %v181_v0 = vmul.f32 %v256_v40, %v328_v5  ;;  %279 = vrcp.f32 %v139_v39 }
  0xb3   :  { %v260_v43 = vpop.eup %259  ;;  %v179_v2 = vmul.f32 %v258_v42, %v333_v6  ;;  %281 = vrcp.f32 %v138_v41 }
  0xb4   :  { %v262_v44 = vpop.eup %261  ;;  %197 = vst [vmem:[%s475_s2 + $0x18] sm:$0xff] %v181_v0  ;;  %v141_v45 = vadd.f32 1.0, %v260_v43 }
  0xb5   :  { %v264_v46 = vpop.eup %263  ;;  %195 = vst [vmem:[%s475_s2 + $0x8] sm:$0xff] %v179_v2  ;;  %v140_v47 = vadd.f32 1.0, %v262_v44 }
  0xb6   :  { %v266_v48 = vpop.eup %265  ;;  %v183_v5 = vmul.f32 %v264_v46, %v340_v9  ;;  %283 = vrcp.f32 %v141_v45 }
  0xb7   :  { %v268_v49 = vpop.eup %267  ;;  %v182_v6 = vmul.f32 %v266_v48, %v345_v10  ;;  %285 = vrcp.f32 %v140_v47 }
  0xb8   :  { %v270_v50 = vpop.eup %269  ;;  %199 = vst [vmem:[%s475_s2 + $0x28] sm:$0xff] %v183_v5  ;;  %v143_v51 = vadd.f32 1.0, %v268_v49 }
  0xb9   :  { %v272_v52 = vpop.eup %271  ;;  %198 = vst [vmem:[%s475_s2 + $0x20] sm:$0xff] %v182_v6  ;;  %v142_v53 = vadd.f32 1.0, %v270_v50 }
  0xba   :  { %v274_v54 = vpop.eup %273  ;;  %v185_v9 = vmul.f32 %v272_v52, %v352_v13  ;;  %287 = vrcp.f32 %v143_v51 }
  0xbb   :  { %v276_v55 = vpop.eup %275  ;;  %v184_v10 = vmul.f32 %v274_v54, %v357_v14  ;;  %289 = vrcp.f32 %v142_v53 }
  0xbc   :  { %v278_v56 = vpop.eup %277  ;;  %201 = vst [vmem:[%s475_s2 + $0x38] sm:$0xff] %v185_v9  ;;  %v145_v57 = vadd.f32 1.0, %v276_v55 }
  0xbd   :  { %200 = vst [vmem:[%s475_s2 + $0x30] sm:$0xff] %v184_v10  ;;  %v144_v58 = vadd.f32 1.0, %v278_v56 }
  0xbe   :  { %291 = vrcp.f32 %v145_v57 }
  0xbf   :  { %v280_v59 = vpop.eup %279  ;;  %293 = vrcp.f32 %v144_v58 }
  0xc0   :  { %v282_v13 = vpop.eup %281  ;;  %v187_v60 = vmul.f32 %v280_v59, %v364_v17 }
  0xc1   :  { %v186_v14 = vmul.f32 %v282_v13, %v369_v18 }
  0xc2   :  { %203 = vst [vmem:[%s475_s2 + $0x48] sm:$0xff] %v187_v60 }
  0xc3   :  { %v284_v61 = vpop.eup %283  ;;  %202 = vst [vmem:[%s475_s2 + $0x40] sm:$0xff] %v186_v14 }
  0xc4   :  { %v286_v62 = vpop.eup %285  ;;  %v189_v63 = vmul.f32 %v284_v61, %v376_v21 }
  0xc5   :  { %v188_v1 = vmul.f32 %v286_v62, %v381_v22 }
  0xc6   :  { %205 = vst [vmem:[%s475_s2 + $0x58] sm:$0xff] %v189_v63 }
  0xc7   :  { %v288_v17 = vpop.eup %287  ;;  %204 = vst [vmem:[%s475_s2 + $0x50] sm:$0xff] %v188_v1 }
  0xc8   :  { %v290_v18 = vpop.eup %289  ;;  %v191_v3 = vmul.f32 %v288_v17, %v388_v25 }
  0xc9   :  { %v190_v4 = vmul.f32 %v290_v18, %v393_v26 }
  0xca   :  { %207 = vst [vmem:[%s475_s2 + $0x68] sm:$0xff] %v191_v3 }
  0xcb   :  { %v292_v21 = vpop.eup %291  ;;  %206 = vst [vmem:[%s475_s2 + $0x60] sm:$0xff] %v190_v4 }
  0xcc   :  { %v294_v22 = vpop.eup %293  ;;  %v193_v7 = vmul.f32 %v292_v21, %v400_v29 }
  0xcd   :  { %v192_v8 = vmul.f32 %v294_v22, %v405_v30 }
  0xce   :  { %209 = vst [vmem:[%s475_s2 + $0x78] sm:$0xff] %v193_v7 }
  0xcf   :  { %208 = vst [vmem:[%s475_s2 + $0x70] sm:$0xff] %v192_v8 }

// kernel: dagnn_conv.6
= control target key start
LH: loop header
LB: loop body
LE: loop exit
PB: predicated region body
PF: predicated region fallthrough
CT: control target
= control target key end

     0   :  { %s1190_s1 = inlined_call_operand.vmem [shape: bf16[128,128], index: 1, kind: input, shape index: {}]   ;;  %s1191_s0 = inlined_call_operand.vmem [shape: bf16[128,128], index: 0, kind: input, shape index: {}]   ;;  %s1192_s3 = inlined_call_operand.vmem [shape: f32[1,128], index: 3, kind: input, shape index: {}]   ;;  %s1193_s4 = inlined_call_operand.vmem [shape: bf16[128,128], index: 4, kind: output, shape index: {0}]   ;;  %s1194_s2 = inlined_call_operand.vmem [shape: f32[128,128], index: 2, kind: input, shape index: {}, may-alias: {2,5}]   ;;  %s1195_s5 = inlined_call_operand.vmem [shape: f32[128,128], index: 5, kind: output, shape index: {1}, may-alias: {2,5}]  }
   0x1   :  { %v811_v0 = vld [vmem:[%s1190_s1 + $0x38] sm:$0xff]   ;;  %v812_v1 = vld [vmem:[%s1190_s1 + $0x30] sm:$0xff]   ;;  %v813_v2 = vld [vmem:[%s1190_s1 + $0x28] sm:$0xff]  }
   0x2   :  { %763 = vmatprep.subr.bf16.mxu0 %v811_v0  ;;  %795 = vmatprep.subr.bf16.mxu1 %v811_v0  ;;  %v814_v3 = vld [vmem:[%s1190_s1 + $0x20] sm:$0xff]   ;;  %v815_v6 = vld [vmem:[%s1190_s1 + $0x18] sm:$0xff]   ;;  %v816_v7 = vld [vmem:[%s1190_s1 + $0x10] sm:$0xff]  }
   0x3   :  { %764 = vmatpush3.bf16.msra.mxu0 %v811_v0  ;;  %803 = vmatpush3.bf16.msra.mxu1 %v811_v0  ;;  %v819_v4 = vld [vmem:[%s1191_s0] sm:$0xff]   ;;  %v817_v8 = vld [vmem:[%s1190_s1 + $0x8] sm:$0xff]   ;;  %v823_v12 = vld [vmem:[%s1191_s0 + $0x10] sm:$0xff]  }
   0x4   :  { %765 = vmatprep.subr.bf16.mxu0 %v812_v1  ;;  %796 = vmatprep.subr.bf16.mxu1 %v812_v1  ;;  %v820_v5 = vld [vmem:[%s1191_s0 + $0x20] sm:$0xff]   ;;  %v821_v10 = vld [vmem:[%s1191_s0 + $0x8] sm:$0xff]   ;;  %v825_v13 = vld [vmem:[%s1191_s0 + $0x30] sm:$0xff]  }
   0x5   :  { %779 = vmatprep.mubr.bf16.mxu0 %v819_v4  ;;  %787 = vmatprep.mubr.bf16.mxu1 %v820_v5  ;;  %v818_v9 = vld [vmem:[%s1190_s1] sm:$0xff]   ;;  %v822_v11 = vld [vmem:[%s1191_s0 + $0x28] sm:$0xff]   ;;  %v824_v14 = vld [vmem:[%s1191_s0 + $0x18] sm:$0xff]  }
   0x6   :  { %v826_v15 = vld [vmem:[%s1191_s0 + $0x38] sm:$0xff]   ;;  %v972_v16 = vld [vmem:[%s1192_s3] ss:$0 sm:$0xff] }
   0x7   :  { %766 = vmatpush3.bf16.msra.mxu0 %v812_v1  ;;  %804 = vmatpush3.bf16.msra.mxu1 %v812_v1 }
   0x8   :  { %767 = vmatprep.subr.bf16.mxu0 %v813_v2  ;;  %797 = vmatprep.subr.bf16.mxu1 %v813_v2 }
   0xb   :  { %768 = vmatpush3.bf16.msra.mxu0 %v813_v2  ;;  %805 = vmatpush3.bf16.msra.mxu1 %v813_v2 }
   0xc   :  { %769 = vmatprep.subr.bf16.mxu0 %v814_v3  ;;  %798 = vmatprep.subr.bf16.mxu1 %v814_v3 }
   0xf   :  { %770 = vmatpush3.bf16.msra.mxu0 %v814_v3  ;;  %806 = vmatpush3.bf16.msra.mxu1 %v814_v3 }
  0x10   :  { %771 = vmatprep.subr.bf16.mxu0 %v815_v6  ;;  %799 = vmatprep.subr.bf16.mxu1 %v815_v6 }
  0x13   :  { %772 = vmatpush3.bf16.msra.mxu0 %v815_v6  ;;  %807 = vmatpush3.bf16.msra.mxu1 %v815_v6 }
  0x14   :  { %773 = vmatprep.subr.bf16.mxu0 %v816_v7  ;;  %800 = vmatprep.subr.bf16.mxu1 %v816_v7 }
  0x17   :  { %774 = vmatpush3.bf16.msra.mxu0 %v816_v7  ;;  %808 = vmatpush3.bf16.msra.mxu1 %v816_v7 }
  0x18   :  { %775 = vmatprep.subr.bf16.mxu0 %v817_v8  ;;  %801 = vmatprep.subr.bf16.mxu1 %v817_v8 }
  0x1b   :  { %776 = vmatpush3.bf16.msra.mxu0 %v817_v8  ;;  %809 = vmatpush3.bf16.msra.mxu1 %v817_v8 }
  0x1c   :  { %777 = vmatprep.subr.bf16.mxu0 %v818_v9  ;;  %802 = vmatprep.subr.bf16.mxu1 %v818_v9 }
  0x1f   :  { %778 = vmatpush3.bf16.msra.mxu0 %v818_v9  ;;  %810 = vmatpush3.bf16.msra.mxu1 %v818_v9 }
  0x22   :  { %780 = vmatmul.mubr.bf16.vlgmr.msra.gmra.mxu0 %v821_v10  ;;  %788 = vmatmul.mubr.bf16.vlgmr.msra.gmra.mxu1 %v822_v11 }
  0x23   :  { %783 = vmatprep.mubr.bf16.mxu0 %v823_v12  ;;  %791 = vmatprep.mubr.bf16.mxu1 %v825_v13 }
  0x2a   :  { %784 = vmatmul.mubr.bf16.gmra.mxu0 %v824_v14  ;;  %792 = vmatmul.mubr.bf16.gmra.mxu1 %v826_v15 }
  0xe2   :  { %v974_v17 = vpop.f32.mrf.mxu0  ;;  %v976_v18 = vpop.f32.mrf.mxu1 }
  0xe3   :  { %v349_v19 = vmul.f32 %v976_v18, %v972_v16  ;;  %v341_v20 = vmul.f32 %v974_v17, %v972_v16 }
  0xe4   :  { %v982_v21 = vpop.f32.mrf.mxu0  ;;  %v984_v22 = vpop.f32.mrf.mxu1 }
  0xe5   :  { %375 = vadd.xlane.f32.xlu0 %v349_v19  ;;  %359 = vadd.xlane.f32.xlu1 %v341_v20  ;;  %v339_v27 = vmul.f32 %v972_v16, %v982_v21  ;;  %v347_v35 = vmul.f32 %v972_v16, %v984_v22 }
  0xe6   :  { %v986_v23 = vpop.f32.mrf.mxu0  ;;  %v988_v24 = vpop.f32.mrf.mxu1 }
  0xe7   :  { %v708_v25 = vpack.c.bf16 %v986_v23, %v974_v17  ;;  %v728_v26 = vpack.c.bf16 %v988_v24, %v976_v18  ;;  %v342_v28 = vmul.f32 %v986_v23, %v972_v16  ;;  %v350_v36 = vmul.f32 %v988_v24, %v972_v16 }
  0xe8   :  { %v998_v29 = vpop.f32.mrf.mxu0  ;;  %v1000_v30 = vpop.f32.mrf.mxu1 }
  0xe9   :  { %740 = vst [vmem:[%s1193_s4 + $0x8] sm:$0xff] %v708_v25   ;;  %744 = vst [vmem:[%s1193_s4 + $0x28] sm:$0xff] %v728_v26   ;;  %v703_v31 = vpack.c.bf16 %v998_v29, %v982_v21  ;;  %v723_v32 = vpack.c.bf16 %v1000_v30, %v984_v22  ;;  %355 = vadd.xlane.f32.xlu0 %v339_v27  ;;  %361 = vadd.xlane.f32.xlu1 %v342_v28 }
  0xea   :  { %v1012_v33 = vpop.f32.mrf.mxu0  ;;  %v1014_v34 = vpop.f32.mrf.mxu1  ;;  %v348_v42 = vmul.f32 %v972_v16, %v1000_v30  ;;  %v340_v43 = vmul.f32 %v972_v16, %v998_v29 }
  0xeb   :  { %704 = vst [vmem:[%s1193_s4] sm:$0xff] %v703_v31   ;;  %743 = vst [vmem:[%s1193_s4 + $0x20] sm:$0xff] %v723_v32   ;;  %v345_v49 = vmul.f32 %v1012_v33, %v972_v16  ;;  %v353_v55 = vmul.f32 %v1014_v34, %v972_v16 }
  0xec   :  { %v1026_v37 = vpop.f32.mrf.mxu0  ;;  %v1028_v38 = vpop.f32.mrf.mxu1 }
  0xed   :  { %371 = vadd.xlane.f32.xlu0 %v347_v35  ;;  %377 = vadd.xlane.f32.xlu1 %v350_v36  ;;  %v343_v51 = vmul.f32 %v972_v16, %v1026_v37  ;;  %v351_v53 = vmul.f32 %v972_v16, %v1028_v38 }
  0xee   :  { %v1030_v39 = vpop.f32.mrf.mxu0  ;;  %v1032_v40 = vpop.f32.mrf.mxu1 }
  0xef   :  { %v718_v41 = vpack.c.bf16 %v1030_v39, %v1012_v33  ;;  %v738_v44 = vpack.c.bf16 %v1032_v40, %v1014_v34  ;;  %v346_v50 = vmul.f32 %v1030_v39, %v972_v16  ;;  %v354_v56 = vmul.f32 %v1032_v40, %v972_v16 }
  0xf0   :  { %v1042_v45 = vpop.f32.mrf.mxu0  ;;  %v1044_v46 = vpop.f32.mrf.mxu1 }
  0xf1   :  { %742 = vst [vmem:[%s1193_s4 + $0x18] sm:$0xff] %v718_v41   ;;  %v713_v47 = vpack.c.bf16 %v1042_v45, %v1026_v37  ;;  %373 = vadd.xlane.f32.xlu1 %v348_v42  ;;  %357 = vadd.xlane.f32.xlu0 %v340_v43  ;;  %746 = vst [vmem:[%s1193_s4 + $0x38] sm:$0xff] %v738_v44   ;;  %v733_v48 = vpack.c.bf16 %v1044_v46, %v1028_v38 }
  0xf2   :  { %v344_v52 = vmul.f32 %v972_v16, %v1042_v45  ;;  %v352_v54 = vmul.f32 %v972_v16, %v1044_v46 }
  0xf3   :  { %741 = vst [vmem:[%s1193_s4 + $0x10] sm:$0xff] %v713_v47   ;;  %745 = vst [vmem:[%s1193_s4 + $0x30] sm:$0xff] %v733_v48  }
  0xf5   :  { %367 = vadd.xlane.f32.xlu0 %v345_v49  ;;  %369 = vadd.xlane.f32.xlu1 %v346_v50 }
  0xf9   :  { %363 = vadd.xlane.f32.xlu0 %v343_v51  ;;  %365 = vadd.xlane.f32.xlu1 %v344_v52 }
  0xfd   :  { %379 = vadd.xlane.f32.xlu0 %v351_v53  ;;  %381 = vadd.xlane.f32.xlu1 %v352_v54 }
 0x101   :  { %383 = vadd.xlane.f32.xlu0 %v353_v55  ;;  %385 = vadd.xlane.f32.xlu1 %v354_v56 }
 0x16e   :  { %v376_v57 = vpop.xlane.xlu0 %375  ;;  %v360_v58 = vpop.xlane.xlu1 %359 }
 0x16f   :  { %v662_v59 = vmul.f32 -1.442695, %v376_v57  ;;  %v654_v60 = vmul.f32 -1.442695, %v360_v58  ;;  %v573_v58 = vld [vmem:[%s1194_s2 + $0x50] sm:$0xff] }
 0x171   :  { %827 = vpow2.f32 %v662_v59 }
 0x172   :  { %829 = vpow2.f32 %v654_v60  ;;  %v356_v61 = vpop.xlane.xlu0 %355  ;;  %v362_v62 = vpop.xlane.xlu1 %361 }
 0x173   :  { %v652_v63 = vmul.f32 -1.442695, %v356_v61  ;;  %v655_v0 = vmul.f32 -1.442695, %v362_v62  ;;  %v565_v61 = vld [vmem:[%s1194_s2 + $0x10] sm:$0xff] }
 0x175   :  { %831 = vpow2.f32 %v652_v63 }
 0x176   :  { %833 = vpow2.f32 %v655_v0  ;;  %v372_v1 = vpop.xlane.xlu0 %371  ;;  %v378_v2 = vpop.xlane.xlu1 %377 }
 0x177   :  { %v660_v3 = vmul.f32 -1.442695, %v372_v1  ;;  %v663_v4 = vmul.f32 -1.442695, %v378_v2 }
 0x179   :  { %835 = vpow2.f32 %v660_v3 }
 0x17a   :  { %837 = vpow2.f32 %v663_v4  ;;  %v374_v5 = vpop.xlane.xlu1 %373  ;;  %v358_v6 = vpop.xlane.xlu0 %357 }
 0x17b   :  { %v661_v7 = vmul.f32 -1.442695, %v374_v5  ;;  %v653_v8 = vmul.f32 -1.442695, %v358_v6  ;;  %v563_v5 = vld [vmem:[%s1194_s2] sm:$0xff] }
 0x17d   :  { %839 = vpow2.f32 %v661_v7 }
 0x17e   :  { %v828_v9 = vpop.eup %827  ;;  %841 = vpow2.f32 %v653_v8  ;;  %v368_v10 = vpop.xlane.xlu0 %367 }
 0x17f   :  { %v370_v11 = vpop.xlane.xlu1 %369  ;;  %v830_v12 = vpop.eup %829  ;;  %v445_v13 = vadd.f32 1.0, %v828_v9  ;;  %v658_v14 = vmul.f32 -1.442695, %v368_v10 }
 0x180   :  { %v437_v15 = vadd.f32 1.0, %v830_v12  ;;  %v659_v16 = vmul.f32 -1.442695, %v370_v11 }
 0x181   :  { %843 = vrcp.f32 %v445_v13 }
 0x182   :  { %v832_v19 = vpop.eup %831  ;;  %845 = vrcp.f32 %v437_v15  ;;  %v364_v20 = vpop.xlane.xlu0 %363 }
 0x183   :  { %v366_v25 = vpop.xlane.xlu1 %365  ;;  %v834_v26 = vpop.eup %833  ;;  %v435_v27 = vadd.f32 1.0, %v832_v19  ;;  %847 = vpow2.f32 %v658_v14  ;;  %v656_v28 = vmul.f32 -1.442695, %v364_v20 }
 0x184   :  { %v438_v31 = vadd.f32 1.0, %v834_v26  ;;  %849 = vpow2.f32 %v659_v16  ;;  %v657_v32 = vmul.f32 -1.442695, %v366_v25 }
 0x185   :  { %851 = vrcp.f32 %v435_v27 }
 0x186   :  { %v836_v35 = vpop.eup %835  ;;  %853 = vrcp.f32 %v438_v31  ;;  %v380_v36 = vpop.xlane.xlu0 %379 }
 0x187   :  { %v382_v41 = vpop.xlane.xlu1 %381  ;;  %v838_v42 = vpop.eup %837  ;;  %v443_v43 = vadd.f32 1.0, %v836_v35  ;;  %855 = vpow2.f32 %v656_v28  ;;  %v664_v44 = vmul.f32 -1.442695, %v380_v36 }
 0x188   :  { %v446_v47 = vadd.f32 1.0, %v838_v42  ;;  %857 = vpow2.f32 %v657_v32  ;;  %v665_v48 = vmul.f32 -1.442695, %v382_v41 }
 0x189   :  { %859 = vrcp.f32 %v443_v43 }
 0x18a   :  { %v840_v49 = vpop.eup %839  ;;  %861 = vrcp.f32 %v446_v47  ;;  %v384_v50 = vpop.xlane.xlu0 %383 }
 0x18b   :  { %v386_v51 = vpop.xlane.xlu1 %385  ;;  %v842_v52 = vpop.eup %841  ;;  %v444_v53 = vadd.f32 1.0, %v840_v49  ;;  %863 = vpow2.f32 %v664_v44  ;;  %v666_v54 = vmul.f32 -1.442695, %v384_v50 }
 0x18c   :  { %v436_v55 = vadd.f32 1.0, %v842_v52  ;;  %865 = vpow2.f32 %v665_v48  ;;  %v667_v56 = vmul.f32 -1.442695, %v386_v51 }
 0x18d   :  { %867 = vrcp.f32 %v444_v53 }
 0x18e   :  { %v844_v57 = vpop.eup %843  ;;  %869 = vrcp.f32 %v436_v55 }
 0x18f   :  { %v846_v59 = vpop.eup %845  ;;  %v589_v60 = vmul.f32 %v844_v57, %v976_v18  ;;  %871 = vpow2.f32 %v666_v54 }
 0x190   :  { %v848_v62 = vpop.eup %847  ;;  %v581_v63 = vmul.f32 %v846_v59, %v974_v17  ;;  %873 = vpow2.f32 %v667_v56 }
 0x191   :  { %v850_v0 = vpop.eup %849  ;;  %v605_v1 = vadd.f32 %v589_v60, %v573_v58  ;;  %v441_v2 = vadd.f32 1.0, %v848_v62 }
 0x192   :  { %v852_v3 = vpop.eup %851  ;;  %v597_v4 = vadd.f32 %v581_v63, %v565_v61  ;;  %v442_v6 = vadd.f32 1.0, %v850_v0 }
 0x193   :  { %v854_v18 = vpop.eup %853  ;;  %621 = vst [vmem:[%s1195_s5 + $0x50] sm:$0xff] %v605_v1  ;;  %v579_v7 = vmul.f32 %v852_v3, %v982_v21  ;;  %875 = vrcp.f32 %v441_v2 }
 0x194   :  { %v856_v8 = vpop.eup %855  ;;  %v582_v9 = vmul.f32 %v854_v18, %v986_v23  ;;  %877 = vrcp.f32 %v442_v6 }
 0x195   :  { %v858_v10 = vpop.eup %857  ;;  %v595_v11 = vadd.f32 %v579_v7, %v563_v5  ;;  %v439_v12 = vadd.f32 1.0, %v856_v8 }
 0x196   :  { %v860_v13 = vpop.eup %859  ;;  %v440_v15 = vadd.f32 1.0, %v858_v10 }
 0x197   :  { %v862_v16 = vpop.eup %861  ;;  %v587_v19 = vmul.f32 %v860_v13, %v984_v22  ;;  %879 = vrcp.f32 %v439_v12 }
 0x198   :  { %v864_v20 = vpop.eup %863  ;;  %v590_v25 = vmul.f32 %v862_v16, %v988_v24  ;;  %881 = vrcp.f32 %v440_v15 }
 0x199   :  { %v866_v26 = vpop.eup %865  ;;  %v447_v28 = vadd.f32 1.0, %v864_v20 }
 0x19a   :  { %v566_v17 = vld [vmem:[%s1194_s2 + $0x18] sm:$0xff]  ;;  %v868_v31 = vpop.eup %867  ;;  %v448_v35 = vadd.f32 1.0, %v866_v26 }
 0x19b   :  { %613 = vst [vmem:[%s1195_s5 + $0x10] sm:$0xff] %v597_v4  ;;  %v598_v14 = vadd.f32 %v582_v9, %v566_v17  ;;  %v870_v36 = vpop.eup %869  ;;  %v588_v41 = vmul.f32 %v868_v31, %v1000_v30  ;;  %883 = vrcp.f32 %v447_v28 }
 0x19c   :  { %v872_v42 = vpop.eup %871  ;;  %v580_v43 = vmul.f32 %v870_v36, %v998_v29  ;;  %885 = vrcp.f32 %v448_v35 }
 0x19d   :  { %v874_v44 = vpop.eup %873  ;;  %v449_v48 = vadd.f32 1.0, %v872_v42 }
 0x19e   :  { %v450_v50 = vadd.f32 1.0, %v874_v44 }
 0x19f   :  { %887 = vrcp.f32 %v449_v48 }
 0x1a0   :  { %v876_v30 = vpop.eup %875  ;;  %889 = vrcp.f32 %v450_v50 }
 0x1a1   :  { %v878_v51 = vpop.eup %877  ;;  %v585_v52 = vmul.f32 %v876_v30, %v1012_v33 }
 0x1a2   :  { %v571_v21 = vld [vmem:[%s1194_s2 + $0x40] sm:$0xff]  ;;  %v586_v54 = vmul.f32 %v878_v51, %v1030_v39 }
 0x1a3   :  { %611 = vst [vmem:[%s1195_s5] sm:$0xff] %v595_v11  ;;  %v603_v27 = vadd.f32 %v587_v19, %v571_v21 }
 0x1a4   :  { %v880_v56 = vpop.eup %879 }
 0x1a5   :  { %v882_v59 = vpop.eup %881  ;;  %v583_v33 = vmul.f32 %v880_v56, %v1026_v37 }
 0x1a6   :  { %v584_v39 = vmul.f32 %v882_v59, %v1042_v45 }
 0x1a8   :  { %v884_v62 = vpop.eup %883 }
 0x1a9   :  { %v886_v1 = vpop.eup %885  ;;  %v591_v37 = vmul.f32 %v884_v62, %v1028_v38 }
 0x1aa   :  { %v574_v23 = vld [vmem:[%s1194_s2 + $0x58] sm:$0xff]  ;;  %v592_v45 = vmul.f32 %v886_v1, %v1044_v46 }
 0x1ab   :  { %614 = vst [vmem:[%s1195_s5 + $0x18] sm:$0xff] %v598_v14  ;;  %v606_v32 = vadd.f32 %v590_v25, %v574_v23 }
 0x1ac   :  { %v888_v4 = vpop.eup %887 }
 0x1ad   :  { %v890_v18 = vpop.eup %889  ;;  %v593_v38 = vmul.f32 %v888_v4, %v1014_v34 }
 0x1ae   :  { %v594_v46 = vmul.f32 %v890_v18, %v1032_v40 }
 0x1b2   :  { %v572_v22 = vld [vmem:[%s1194_s2 + $0x48] sm:$0xff] }
 0x1b3   :  { %619 = vst [vmem:[%s1195_s5 + $0x40] sm:$0xff] %v603_v27  ;;  %v604_v47 = vadd.f32 %v588_v41, %v572_v22 }
 0x1ba   :  { %v564_v24 = vld [vmem:[%s1194_s2 + $0x8] sm:$0xff] }
 0x1bb   :  { %622 = vst [vmem:[%s1195_s5 + $0x58] sm:$0xff] %v606_v32  ;;  %v596_v49 = vadd.f32 %v580_v43, %v564_v24  ;;  %620 = vst [vmem:[%s1195_s5 + $0x48] sm:$0xff] %v604_v47 }
 0x1bd   :  { %612 = vst [vmem:[%s1195_s5 + $0x8] sm:$0xff] %v596_v49 }
 0x1c4   :  { %v569_v29 = vld [vmem:[%s1194_s2 + $0x30] sm:$0xff]  ;;  %v570_v53 = vld [vmem:[%s1194_s2 + $0x38] sm:$0xff]  ;;  %v567_v58 = vld [vmem:[%s1194_s2 + $0x20] sm:$0xff] }
 0x1c5   :  { %v601_v55 = vadd.f32 %v585_v52, %v569_v29  ;;  %v602_v57 = vadd.f32 %v586_v54, %v570_v53  ;;  %v599_v61 = vadd.f32 %v583_v33, %v567_v58 }
 0x1c7   :  { %617 = vst [vmem:[%s1195_s5 + $0x30] sm:$0xff] %v601_v55 }
 0x1ce   :  { %v568_v60 = vld [vmem:[%s1194_s2 + $0x28] sm:$0xff] }
 0x1cf   :  { %618 = vst [vmem:[%s1195_s5 + $0x38] sm:$0xff] %v602_v57  ;;  %v600_v63 = vadd.f32 %v584_v39, %v568_v60 }
 0x1d6   :  { %v575_v0 = vld [vmem:[%s1194_s2 + $0x60] sm:$0xff] }
 0x1d7   :  { %615 = vst [vmem:[%s1195_s5 + $0x20] sm:$0xff] %v599_v61  ;;  %v607_v3 = vadd.f32 %v591_v37, %v575_v0 }
 0x1de   :  { %v576_v2 = vld [vmem:[%s1194_s2 + $0x68] sm:$0xff] }
 0x1df   :  { %616 = vst [vmem:[%s1195_s5 + $0x28] sm:$0xff] %v600_v63  ;;  %v608_v5 = vadd.f32 %v592_v45, %v576_v2 }
 0x1e6   :  { %v577_v6 = vld [vmem:[%s1194_s2 + $0x70] sm:$0xff] }
 0x1e7   :  { %623 = vst [vmem:[%s1195_s5 + $0x60] sm:$0xff] %v607_v3  ;;  %v609_v17 = vadd.f32 %v593_v38, %v577_v6 }
 0x1ee   :  { %v578_v7 = vld [vmem:[%s1194_s2 + $0x78] sm:$0xff] }
 0x1ef   :  { %624 = vst [vmem:[%s1195_s5 + $0x68] sm:$0xff] %v608_v5  ;;  %v610_v8 = vadd.f32 %v594_v46, %v578_v7  ;;  %625 = vst [vmem:[%s1195_s5 + $0x70] sm:$0xff] %v609_v17 }
 0x1f1   :  { %626 = vst [vmem:[%s1195_s5 + $0x78] sm:$0xff] %v610_v8 }

// kernel: dagnn_conv.9
= control target key start
LH: loop header
LB: loop body
LE: loop exit
PB: predicated region body
PF: predicated region fallthrough
CT: control target
= control target key end

     0   :  { %s1192_s0 = inlined_call_operand.vmem [shape: bf16[128,128], index: 0, kind: input, shape index: {}]   ;;  %s1193_s1 = inlined_call_operand.vmem [shape: bf16[128,128], index: 1, kind: input, shape index: {}]   ;;  %s1194_s2 = inlined_call_operand.vmem [shape: f32[128,128], index: 2, kind: input, shape index: {}, may-alias: {2,5}]   ;;  %s1195_s3 = inlined_call_operand.vmem [shape: f32[1,128], index: 3, kind: input, shape index: {}]   ;;  %s1196_s4 = inlined_call_operand.hbm [shape: bf16[128,128], index: 4, kind: output, shape index: {0}]   ;;  %s1197_s5 = inlined_call_operand.vmem [shape: f32[128,128], index: 5, kind: output, shape index: {1}, may-alias: {2,5}]  }
   0x1   :  { %v827_v0 = vld [vmem:[%s1193_s1 + $0x38] sm:$0xff]   ;;  %v828_v1 = vld [vmem:[%s1193_s1 + $0x30] sm:$0xff]   ;;  %v829_v2 = vld [vmem:[%s1193_s1 + $0x28] sm:$0xff]  }
   0x2   :  { %776 = vmatprep.subr.bf16.mxu0 %v827_v0  ;;  %808 = vmatprep.subr.bf16.mxu1 %v827_v0  ;;  %v830_v3 = vld [vmem:[%s1193_s1 + $0x20] sm:$0xff]   ;;  %v831_v6 = vld [vmem:[%s1193_s1 + $0x18] sm:$0xff]   ;;  %v832_v7 = vld [vmem:[%s1193_s1 + $0x10] sm:$0xff]  }
   0x3   :  { %777 = vmatpush3.bf16.msra.mxu0 %v827_v0  ;;  %816 = vmatpush3.bf16.msra.mxu1 %v827_v0  ;;  %v835_v4 = vld [vmem:[%s1192_s0] sm:$0xff]  }
   0x4   :  { %778 = vmatprep.subr.bf16.mxu0 %v828_v1  ;;  %809 = vmatprep.subr.bf16.mxu1 %v828_v1  ;;  %v836_v5 = vld [vmem:[%s1192_s0 + $0x20] sm:$0xff]  }
   0x5   :  { %792 = vmatprep.mubr.bf16.mxu0 %v835_v4  ;;  %800 = vmatprep.mubr.bf16.mxu1 %v836_v5 }
   0x7   :  { %779 = vmatpush3.bf16.msra.mxu0 %v828_v1  ;;  %817 = vmatpush3.bf16.msra.mxu1 %v828_v1 }
   0x8   :  { %780 = vmatprep.subr.bf16.mxu0 %v829_v2  ;;  %810 = vmatprep.subr.bf16.mxu1 %v829_v2 }
   0xb   :  { %781 = vmatpush3.bf16.msra.mxu0 %v829_v2  ;;  %818 = vmatpush3.bf16.msra.mxu1 %v829_v2 }
   0xc   :  { %782 = vmatprep.subr.bf16.mxu0 %v830_v3  ;;  %811 = vmatprep.subr.bf16.mxu1 %v830_v3 }
   0xf   :  { %783 = vmatpush3.bf16.msra.mxu0 %v830_v3  ;;  %819 = vmatpush3.bf16.msra.mxu1 %v830_v3 }
  0x10   :  { %784 = vmatprep.subr.bf16.mxu0 %v831_v6  ;;  %812 = vmatprep.subr.bf16.mxu1 %v831_v6 }
  0x11   :  { %11 = vsyncpa [#allocation4], 0  ;;  %v833_v8 = vld [vmem:[%s1193_s1 + $0x8] sm:$0xff]   ;;  %v834_v9 = vld [vmem:[%s1193_s1] sm:$0xff]  }
  0x12   :  { %v837_v10 = vld [vmem:[%s1192_s0 + $0x8] sm:$0xff]   ;;  %v839_v12 = vld [vmem:[%s1192_s0 + $0x10] sm:$0xff]   ;;  %v840_v14 = vld [vmem:[%s1192_s0 + $0x18] sm:$0xff]  }
  0x13   :  { %785 = vmatpush3.bf16.msra.mxu0 %v831_v6  ;;  %820 = vmatpush3.bf16.msra.mxu1 %v831_v6  ;;  %v838_v11 = vld [vmem:[%s1192_s0 + $0x28] sm:$0xff]   ;;  %v841_v13 = vld [vmem:[%s1192_s0 + $0x30] sm:$0xff]   ;;  %v842_v15 = vld [vmem:[%s1192_s0 + $0x38] sm:$0xff]   ;;  %s929_s0 = smov [#allocation3]  }
  0x14   :  { %786 = vmatprep.subr.bf16.mxu0 %v832_v7  ;;  %813 = vmatprep.subr.bf16.mxu1 %v832_v7  ;;  %v664_v16 = vld [vmem:[%s1195_s3] ss:$0 sm:$0xff]  ;;  %s633_s3 = sshll.u32 %s929_s0, 4  ;;  %s634_s3 = int_to_ptr.vmem [resolvable:$true] %s633_s3 }
  0x15   :  { %s907_s26 = scalar_lea.vmem %s634_s3, 1024  ;;  %p912_p1 = scmp.lt.s32.totalorder %s634_s3, %s634_s3 }
  0x16   :  { %p908_p0 = scmp.ne.s32.totalorder %s634_s3, %s907_s26  ;;  %p913_p2 = scmp.lt.s32.totalorder %s907_s26, %s907_s26 }
  0x17   :  { %787 = vmatpush3.bf16.msra.mxu0 %v832_v7  ;;  %821 = vmatpush3.bf16.msra.mxu1 %v832_v7 }
  0x18   :  { %788 = vmatprep.subr.bf16.mxu0 %v833_v8  ;;  %814 = vmatprep.subr.bf16.mxu1 %v833_v8  ;;  %p914_p3 = por %p913_p2, %p912_p1 }
  0x1a   :  { %p915_p4 = pnand %p914_p3, %p908_p0 }
  0x1b   :  { %789 = vmatpush3.bf16.msra.mxu0 %v833_v8  ;;  %822 = vmatpush3.bf16.msra.mxu1 %v833_v8 }
  0x1c   :  { %790 = vmatprep.subr.bf16.mxu0 %v834_v9  ;;  %815 = vmatprep.subr.bf16.mxu1 %v834_v9 }
  0x1f   :  { %791 = vmatpush3.bf16.msra.mxu0 %v834_v9  ;;  %823 = vmatpush3.bf16.msra.mxu1 %v834_v9 }
  0x22   :  { %793 = vmatmul.mubr.bf16.vlgmr.msra.gmra.mxu0 %v837_v10  ;;  %801 = vmatmul.mubr.bf16.vlgmr.msra.gmra.mxu1 %v838_v11 }
  0x23   :  { %796 = vmatprep.mubr.bf16.mxu0 %v839_v12  ;;  %804 = vmatprep.mubr.bf16.mxu1 %v841_v13 }
  0x2a   :  { %797 = vmatmul.mubr.bf16.gmra.mxu0 %v840_v14  ;;  %805 = vmatmul.mubr.bf16.gmra.mxu1 %v842_v15 }
  0xe2   :  { %v1013_v17 = vpop.f32.mrf.mxu0  ;;  %v1015_v18 = vpop.f32.mrf.mxu1 }
  0xe3   :  { %v350_v19 = vmul.f32 %v1015_v18, %v664_v16  ;;  %v342_v20 = vmul.f32 %v1013_v17, %v664_v16 }
  0xe4   :  { %v1019_v21 = vpop.f32.mrf.mxu0  ;;  %v1021_v22 = vpop.f32.mrf.mxu1 }
  0xe5   :  { %376 = vadd.xlane.f32.xlu0 %v350_v19  ;;  %360 = vadd.xlane.f32.xlu1 %v342_v20  ;;  %v340_v27 = vmul.f32 %v664_v16, %v1019_v21  ;;  %v348_v35 = vmul.f32 %v664_v16, %v1021_v22 }
  0xe6   :  { %v1023_v23 = vpop.f32.mrf.mxu0  ;;  %v1025_v24 = vpop.f32.mrf.mxu1 }
  0xe7   :  { %v721_v25 = vpack.c.bf16 %v1023_v23, %v1013_v17  ;;  %v741_v26 = vpack.c.bf16 %v1025_v24, %v1015_v18  ;;  %v343_v28 = vmul.f32 %v1023_v23, %v664_v16  ;;  %v351_v36 = vmul.f32 %v1025_v24, %v664_v16 }
  0xe8   :  { %v1033_v29 = vpop.f32.mrf.mxu0  ;;  %v1035_v30 = vpop.f32.mrf.mxu1 }
  0xe9   :  { %753 = vst [vmem:[#allocation3 + $0x8] sm:$0xff] %v721_v25   ;;  %757 = vst [vmem:[#allocation3 + $0x28] sm:$0xff] %v741_v26   ;;  %v716_v31 = vpack.c.bf16 %v1033_v29, %v1019_v21  ;;  %v736_v32 = vpack.c.bf16 %v1035_v30, %v1021_v22  ;;  %356 = vadd.xlane.f32.xlu0 %v340_v27  ;;  %362 = vadd.xlane.f32.xlu1 %v343_v28 }
  0xea   :  { %v1041_v33 = vpop.f32.mrf.mxu0  ;;  %v1043_v34 = vpop.f32.mrf.mxu1  ;;  %v349_v42 = vmul.f32 %v664_v16, %v1035_v30  ;;  %v341_v43 = vmul.f32 %v664_v16, %v1033_v29 }
  0xeb   :  { %717 = vst [vmem:[#allocation3] sm:$0xff] %v716_v31   ;;  %756 = vst [vmem:[#allocation3 + $0x20] sm:$0xff] %v736_v32   ;;  %v346_v49 = vmul.f32 %v1041_v33, %v664_v16  ;;  %v354_v55 = vmul.f32 %v1043_v34, %v664_v16 }
  0xec   :  { %v1047_v37 = vpop.f32.mrf.mxu0  ;;  %v1049_v38 = vpop.f32.mrf.mxu1 }
  0xed   :  { %372 = vadd.xlane.f32.xlu0 %v348_v35  ;;  %378 = vadd.xlane.f32.xlu1 %v351_v36  ;;  %v344_v51 = vmul.f32 %v664_v16, %v1047_v37  ;;  %v352_v53 = vmul.f32 %v664_v16, %v1049_v38 }
  0xee   :  { %v1051_v39 = vpop.f32.mrf.mxu0  ;;  %v1053_v40 = vpop.f32.mrf.mxu1 }
  0xef   :  { %v731_v41 = vpack.c.bf16 %v1051_v39, %v1041_v33  ;;  %v751_v44 = vpack.c.bf16 %v1053_v40, %v1043_v34  ;;  %v347_v50 = vmul.f32 %v1051_v39, %v664_v16  ;;  %v355_v56 = vmul.f32 %v1053_v40, %v664_v16 }
  0xf0   :  { %v1061_v45 = vpop.f32.mrf.mxu0  ;;  %v1063_v46 = vpop.f32.mrf.mxu1 }
  0xf1   :  { %755 = vst [vmem:[#allocation3 + $0x18] sm:$0xff] %v731_v41   ;;  %v726_v47 = vpack.c.bf16 %v1061_v45, %v1047_v37  ;;  %374 = vadd.xlane.f32.xlu1 %v349_v42  ;;  %358 = vadd.xlane.f32.xlu0 %v341_v43  ;;  %759 = vst [vmem:[#allocation3 + $0x38] sm:$0xff] %v751_v44   ;;  %v746_v48 = vpack.c.bf16 %v1063_v46, %v1049_v38 }
  0xf2   :  { %v345_v52 = vmul.f32 %v664_v16, %v1061_v45  ;;  %v353_v54 = vmul.f32 %v664_v16, %v1063_v46 }
  0xf3   :  { %754 = vst [vmem:[#allocation3 + $0x10] sm:$0xff] %v726_v47   ;;  %758 = vst [vmem:[#allocation3 + $0x30] sm:$0xff] %v746_v48  }
  0xf5   :  { %368 = vadd.xlane.f32.xlu0 %v346_v49  ;;  %370 = vadd.xlane.f32.xlu1 %v347_v50 }
  0xf9   :  { %364 = vadd.xlane.f32.xlu0 %v344_v51  ;;  %366 = vadd.xlane.f32.xlu1 %v345_v52 }
  0xfd   :  { %380 = vadd.xlane.f32.xlu0 %v352_v53  ;;  %382 = vadd.xlane.f32.xlu1 %v353_v54 }
 0x101   :  { %384 = vadd.xlane.f32.xlu0 %v354_v55  ;;  %386 = vadd.xlane.f32.xlu1 %v355_v56 }
 0x102   :  { %918 = shalt.err (!%p915_p4)
}
 0x103   :  { %s930_s27 = smov 64   ;;  %s931_s28 = smov 4  }
 0x104   :  { %639 = dma.vmem_to_hbm [thread:$0]  %s634_s3, 1024, %s1196_s4, [#allocation4], %s930_s27, %s930_s27, %s931_s28  }
 0x16e   :  { %v377_v57 = vpop.xlane.xlu0 %376  ;;  %v361_v58 = vpop.xlane.xlu1 %360 }
 0x16f   :  { %v675_v59 = vmul.f32 -1.442695, %v377_v57  ;;  %v667_v60 = vmul.f32 -1.442695, %v361_v58  ;;  %v574_v58 = vld [vmem:[%s1194_s2 + $0x50] sm:$0xff] }
 0x171   :  { %843 = vpow2.f32 %v675_v59 }
 0x172   :  { %845 = vpow2.f32 %v667_v60  ;;  %v357_v61 = vpop.xlane.xlu0 %356  ;;  %v363_v62 = vpop.xlane.xlu1 %362 }
 0x173   :  { %v665_v63 = vmul.f32 -1.442695, %v357_v61  ;;  %v668_v0 = vmul.f32 -1.442695, %v363_v62  ;;  %v566_v61 = vld [vmem:[%s1194_s2 + $0x10] sm:$0xff] }
 0x175   :  { %847 = vpow2.f32 %v665_v63 }
 0x176   :  { %849 = vpow2.f32 %v668_v0  ;;  %v373_v1 = vpop.xlane.xlu0 %372  ;;  %v379_v2 = vpop.xlane.xlu1 %378 }
 0x177   :  { %v673_v3 = vmul.f32 -1.442695, %v373_v1  ;;  %v676_v4 = vmul.f32 -1.442695, %v379_v2 }
 0x179   :  { %851 = vpow2.f32 %v673_v3 }
 0x17a   :  { %853 = vpow2.f32 %v676_v4  ;;  %v375_v5 = vpop.xlane.xlu1 %374  ;;  %v359_v6 = vpop.xlane.xlu0 %358 }
 0x17b   :  { %v674_v7 = vmul.f32 -1.442695, %v375_v5  ;;  %v666_v8 = vmul.f32 -1.442695, %v359_v6  ;;  %v564_v5 = vld [vmem:[%s1194_s2] sm:$0xff] }
 0x17d   :  { %855 = vpow2.f32 %v674_v7 }
 0x17e   :  { %v844_v9 = vpop.eup %843  ;;  %857 = vpow2.f32 %v666_v8  ;;  %v369_v10 = vpop.xlane.xlu0 %368 }
 0x17f   :  { %v371_v11 = vpop.xlane.xlu1 %370  ;;  %v846_v12 = vpop.eup %845  ;;  %v446_v13 = vadd.f32 1.0, %v844_v9  ;;  %v671_v14 = vmul.f32 -1.442695, %v369_v10 }
 0x180   :  { %v438_v15 = vadd.f32 1.0, %v846_v12  ;;  %v672_v16 = vmul.f32 -1.442695, %v371_v11 }
 0x181   :  { %859 = vrcp.f32 %v446_v13 }
 0x182   :  { %v848_v19 = vpop.eup %847  ;;  %861 = vrcp.f32 %v438_v15  ;;  %v365_v20 = vpop.xlane.xlu0 %364 }
 0x183   :  { %v367_v25 = vpop.xlane.xlu1 %366  ;;  %v850_v26 = vpop.eup %849  ;;  %v436_v27 = vadd.f32 1.0, %v848_v19  ;;  %863 = vpow2.f32 %v671_v14  ;;  %v669_v28 = vmul.f32 -1.442695, %v365_v20 }
 0x184   :  { %v439_v31 = vadd.f32 1.0, %v850_v26  ;;  %865 = vpow2.f32 %v672_v16  ;;  %v670_v32 = vmul.f32 -1.442695, %v367_v25 }
 0x185   :  { %867 = vrcp.f32 %v436_v27 }
 0x186   :  { %v852_v35 = vpop.eup %851  ;;  %869 = vrcp.f32 %v439_v31  ;;  %v381_v36 = vpop.xlane.xlu0 %380 }
 0x187   :  { %v383_v41 = vpop.xlane.xlu1 %382  ;;  %v854_v42 = vpop.eup %853  ;;  %v444_v43 = vadd.f32 1.0, %v852_v35  ;;  %871 = vpow2.f32 %v669_v28  ;;  %v677_v44 = vmul.f32 -1.442695, %v381_v36 }
 0x188   :  { %v447_v47 = vadd.f32 1.0, %v854_v42  ;;  %873 = vpow2.f32 %v670_v32  ;;  %v678_v48 = vmul.f32 -1.442695, %v383_v41 }
 0x189   :  { %875 = vrcp.f32 %v444_v43 }
 0x18a   :  { %v856_v49 = vpop.eup %855  ;;  %877 = vrcp.f32 %v447_v47  ;;  %v385_v50 = vpop.xlane.xlu0 %384 }
 0x18b   :  { %v387_v51 = vpop.xlane.xlu1 %386  ;;  %v858_v52 = vpop.eup %857  ;;  %v445_v53 = vadd.f32 1.0, %v856_v49  ;;  %879 = vpow2.f32 %v677_v44  ;;  %v679_v54 = vmul.f32 -1.442695, %v385_v50 }
 0x18c   :  { %v437_v55 = vadd.f32 1.0, %v858_v52  ;;  %881 = vpow2.f32 %v678_v48  ;;  %v680_v56 = vmul.f32 -1.442695, %v387_v51 }
 0x18d   :  { %883 = vrcp.f32 %v445_v53 }
 0x18e   :  { %v860_v57 = vpop.eup %859  ;;  %885 = vrcp.f32 %v437_v55 }
 0x18f   :  { %v862_v59 = vpop.eup %861  ;;  %v590_v60 = vmul.f32 %v860_v57, %v1015_v18  ;;  %887 = vpow2.f32 %v679_v54 }
 0x190   :  { %v864_v62 = vpop.eup %863  ;;  %v582_v63 = vmul.f32 %v862_v59, %v1013_v17  ;;  %889 = vpow2.f32 %v680_v56 }
 0x191   :  { %v866_v0 = vpop.eup %865  ;;  %v606_v1 = vadd.f32 %v590_v60, %v574_v58  ;;  %v442_v2 = vadd.f32 1.0, %v864_v62 }
 0x192   :  { %v868_v3 = vpop.eup %867  ;;  %v598_v4 = vadd.f32 %v582_v63, %v566_v61  ;;  %v443_v6 = vadd.f32 1.0, %v866_v0 }
 0x193   :  { %v870_v18 = vpop.eup %869  ;;  %622 = vst [vmem:[%s1197_s5 + $0x50] sm:$0xff] %v606_v1  ;;  %v580_v7 = vmul.f32 %v868_v3, %v1019_v21  ;;  %891 = vrcp.f32 %v442_v2 }
 0x194   :  { %v872_v8 = vpop.eup %871  ;;  %v583_v9 = vmul.f32 %v870_v18, %v1023_v23  ;;  %893 = vrcp.f32 %v443_v6 }
 0x195   :  { %v874_v10 = vpop.eup %873  ;;  %v596_v11 = vadd.f32 %v580_v7, %v564_v5  ;;  %v440_v12 = vadd.f32 1.0, %v872_v8 }
 0x196   :  { %v876_v13 = vpop.eup %875  ;;  %v441_v15 = vadd.f32 1.0, %v874_v10 }
 0x197   :  { %v878_v16 = vpop.eup %877  ;;  %v588_v19 = vmul.f32 %v876_v13, %v1021_v22  ;;  %895 = vrcp.f32 %v440_v12 }
 0x198   :  { %v880_v20 = vpop.eup %879  ;;  %v591_v25 = vmul.f32 %v878_v16, %v1025_v24  ;;  %897 = vrcp.f32 %v441_v15 }
 0x199   :  { %v882_v26 = vpop.eup %881  ;;  %v448_v28 = vadd.f32 1.0, %v880_v20 }
 0x19a   :  { %v567_v17 = vld [vmem:[%s1194_s2 + $0x18] sm:$0xff]  ;;  %v884_v31 = vpop.eup %883  ;;  %v449_v35 = vadd.f32 1.0, %v882_v26 }
 0x19b   :  { %614 = vst [vmem:[%s1197_s5 + $0x10] sm:$0xff] %v598_v4  ;;  %v599_v14 = vadd.f32 %v583_v9, %v567_v17  ;;  %v886_v36 = vpop.eup %885  ;;  %v589_v41 = vmul.f32 %v884_v31, %v1035_v30  ;;  %899 = vrcp.f32 %v448_v28 }
 0x19c   :  { %v888_v42 = vpop.eup %887  ;;  %v581_v43 = vmul.f32 %v886_v36, %v1033_v29  ;;  %901 = vrcp.f32 %v449_v35 }
 0x19d   :  { %v890_v44 = vpop.eup %889  ;;  %v450_v48 = vadd.f32 1.0, %v888_v42 }
 0x19e   :  { %v451_v50 = vadd.f32 1.0, %v890_v44 }
 0x19f   :  { %903 = vrcp.f32 %v450_v48 }
 0x1a0   :  { %v892_v30 = vpop.eup %891  ;;  %905 = vrcp.f32 %v451_v50 }
 0x1a1   :  { %v894_v51 = vpop.eup %893  ;;  %v586_v52 = vmul.f32 %v892_v30, %v1041_v33 }
 0x1a2   :  { %v572_v21 = vld [vmem:[%s1194_s2 + $0x40] sm:$0xff]  ;;  %v587_v54 = vmul.f32 %v894_v51, %v1051_v39 }
 0x1a3   :  { %612 = vst [vmem:[%s1197_s5] sm:$0xff] %v596_v11  ;;  %v604_v27 = vadd.f32 %v588_v19, %v572_v21 }
 0x1a4   :  { %v896_v56 = vpop.eup %895 }
 0x1a5   :  { %v898_v59 = vpop.eup %897  ;;  %v584_v33 = vmul.f32 %v896_v56, %v1047_v37 }
 0x1a6   :  { %v585_v39 = vmul.f32 %v898_v59, %v1061_v45 }
 0x1a8   :  { %v900_v62 = vpop.eup %899 }
 0x1a9   :  { %v902_v1 = vpop.eup %901  ;;  %v592_v37 = vmul.f32 %v900_v62, %v1049_v38 }
 0x1aa   :  { %v575_v23 = vld [vmem:[%s1194_s2 + $0x58] sm:$0xff]  ;;  %v593_v45 = vmul.f32 %v902_v1, %v1063_v46 }
 0x1ab   :  { %615 = vst [vmem:[%s1197_s5 + $0x18] sm:$0xff] %v599_v14  ;;  %v607_v32 = vadd.f32 %v591_v25, %v575_v23 }
 0x1ac   :  { %v904_v4 = vpop.eup %903 }
 0x1ad   :  { %v906_v18 = vpop.eup %905  ;;  %v594_v38 = vmul.f32 %v904_v4, %v1043_v34 }
 0x1ae   :  { %v595_v46 = vmul.f32 %v906_v18, %v1053_v40 }
 0x1b2   :  { %v573_v22 = vld [vmem:[%s1194_s2 + $0x48] sm:$0xff] }
 0x1b3   :  { %620 = vst [vmem:[%s1197_s5 + $0x40] sm:$0xff] %v604_v27  ;;  %v605_v47 = vadd.f32 %v589_v41, %v573_v22 }
 0x1ba   :  { %v565_v24 = vld [vmem:[%s1194_s2 + $0x8] sm:$0xff] }
 0x1bb   :  { %623 = vst [vmem:[%s1197_s5 + $0x58] sm:$0xff] %v607_v32  ;;  %v597_v49 = vadd.f32 %v581_v43, %v565_v24  ;;  %621 = vst [vmem:[%s1197_s5 + $0x48] sm:$0xff] %v605_v47 }
 0x1bd   :  { %613 = vst [vmem:[%s1197_s5 + $0x8] sm:$0xff] %v597_v49 }
 0x1c4   :  { %v570_v29 = vld [vmem:[%s1194_s2 + $0x30] sm:$0xff]  ;;  %v571_v53 = vld [vmem:[%s1194_s2 + $0x38] sm:$0xff]  ;;  %v568_v58 = vld [vmem:[%s1194_s2 + $0x20] sm:$0xff] }
 0x1c5   :  { %v602_v55 = vadd.f32 %v586_v52, %v570_v29  ;;  %v603_v57 = vadd.f32 %v587_v54, %v571_v53  ;;  %v600_v61 = vadd.f32 %v584_v33, %v568_v58 }
 0x1c7   :  { %618 = vst [vmem:[%s1197_s5 + $0x30] sm:$0xff] %v602_v55 }
 0x1ce   :  { %v569_v60 = vld [vmem:[%s1194_s2 + $0x28] sm:$0xff] }
 0x1cf   :  { %619 = vst [vmem:[%s1197_s5 + $0x38] sm:$0xff] %v603_v57  ;;  %v601_v63 = vadd.f32 %v585_v39, %v569_v60 }
 0x1d6   :  { %v576_v0 = vld [vmem:[%s1194_s2 + $0x60] sm:$0xff] }
 0x1d7   :  { %616 = vst [vmem:[%s1197_s5 + $0x20] sm:$0xff] %v600_v61  ;;  %v608_v3 = vadd.f32 %v592_v37, %v576_v0 }
 0x1de   :  { %v577_v2 = vld [vmem:[%s1194_s2 + $0x68] sm:$0xff] }
 0x1df   :  { %617 = vst [vmem:[%s1197_s5 + $0x28] sm:$0xff] %v601_v63  ;;  %v609_v5 = vadd.f32 %v593_v45, %v577_v2 }
 0x1e6   :  { %v578_v6 = vld [vmem:[%s1194_s2 + $0x70] sm:$0xff] }
 0x1e7   :  { %624 = vst [vmem:[%s1197_s5 + $0x60] sm:$0xff] %v608_v3  ;;  %v610_v17 = vadd.f32 %v594_v38, %v578_v6 }
 0x1ee   :  { %v579_v7 = vld [vmem:[%s1194_s2 + $0x78] sm:$0xff] }
 0x1ef   :  { %625 = vst [vmem:[%s1197_s5 + $0x68] sm:$0xff] %v609_v5  ;;  %v611_v8 = vadd.f32 %v595_v46, %v579_v7  ;;  %626 = vst [vmem:[%s1197_s5 + $0x70] sm:$0xff] %v610_v17 }
 0x1f1   :  { %627 = vst [vmem:[%s1197_s5 + $0x78] sm:$0xff] %v611_v8 }
 0x1f2   :  { %927 = dma.done.wait [#allocation4], 1024  }
 0x1f3   :  { %928 = vsyncadd [#allocation4], 4294966272 }
 0x1f4   :  { %647 = vsyncpa [#allocation4], 1 }

</bundles_post_ra>
